<compile_context>
chip_gen: v5e
topology: v5e:2x2
jax: 0.10.0
libtpu: 0.0.40
codegen_flags: <defaults>
</compile_context>

<pallas_src>
import jax
import jax.numpy as jnp
from jax.experimental import pallas as pl
from jax.experimental.pallas import tpu as pltpu

P_DROP = 0.5
SCALE = 1.0 / (1.0 - P_DROP)  # = 2.0


def dropout_add_kernel(bits_ref, x1_ref, x2_ref, o_ref):
    # One uint32 random word per element; use two independent bits of it.
    bits = bits_ref[...]
    keep1 = (bits & jnp.uint32(1)) != 0
    keep2 = (bits & jnp.uint32(2)) != 0

    x1 = x1_ref[...]
    x2 = x2_ref[...]
    zero = jnp.zeros((), dtype=x1.dtype)

    # Fold the 1/(1-p) scale into a single multiply after the add.
    summed = jnp.where(keep1, x1, zero) + jnp.where(keep2, x2, zero)
    o_ref[...] = (summed * jnp.asarray(SCALE, dtype=x1.dtype)).astype(o_ref.dtype)


def dropout_add(x1, x2, key, *, tm=256, tn=1024):
    """t1 + t2 where t_i = dropout(x_i, p=0.5, training=True).

    tm/tn: tile sizes.  Defaults (256, 1024) f32 = 1 MiB per tile; with 4
    streams x 2 pipeline buffers that is ~8 MiB of VMEM, safe on v5e/v6e/v7x
    without raising vmem_limit_bytes.  Raise tiles for very large arrays on
    v5e/v6e (128 MiB VMEM) if desired.
    """
    assert x1.shape == x2.shape and x1.dtype == x2.dtype and x1.ndim == 2
    M, N = x1.shape
    tm = min(tm, M)
    tn = min(tn, N)
    grid = (pl.cdiv(M, tm), pl.cdiv(N, tn))

    # Host-side random bits: per-tile slices are independent by construction,
    # so no seed/program_id mixing is needed inside the kernel.
    bits = jax.random.bits(key, x1.shape, dtype=jnp.uint32)

    spec = pl.BlockSpec((tm, tn), lambda i, j: (i, j))
    return pl.pallas_call(
        dropout_add_kernel,
        out_shape=jax.ShapeDtypeStruct(x1.shape, x1.dtype),
        grid=grid,
        in_specs=[spec, spec, spec],   # bits, x1, x2
        out_specs=spec,
        compiler_params=pltpu.CompilerParams(
            dimension_semantics=("parallel", "parallel"),
        ),
    )(bits, x1, x2)


if __name__ == "__main__":
    key = jax.random.PRNGKey(0)
    k1, k2, kd = jax.random.split(key, 3)

    # Small demo shape (the original module used (1, 2); we pick a TPU
    # tile-friendly small 2-D shape).  tm=128, tn=512 -> a 2x2 grid so the
    # tiled/pipelined path is exercised.
    M, N = 256, 1024
    x1 = jax.random.normal(k1, (M, N), dtype=jnp.float32)
    x2 = jax.random.normal(k2, (M, N), dtype=jnp.float32)

    out = dropout_add(x1, x2, kd, tm=128, tn=512)
    out = jax.block_until_ready(out)

    # Reference: regenerate the same bits (same key/shape/dtype) and apply
    # dropout(p=0.5)+add in plain JAX.
    bits = jax.random.bits(kd, (M, N), dtype=jnp.uint32)
    keep1 = (bits & jnp.uint32(1)) != 0
    keep2 = (bits & jnp.uint32(2)) != 0
    ref = (jnp.where(keep1, x1, 0.0) + jnp.where(keep2, x2, 0.0)) * SCALE
    assert jnp.allclose(out, ref, atol=1e-6), "output mismatch vs dropout(p=0.5)+add reference"

    print("KERNEL_OK")
</pallas_src>

<mosaic_0001>
module attributes {stable_mosaic.version = 11 : i64} {
  func.func @dropout_add_kernel(%arg0: i32, %arg1: i32, %arg2: memref<128x512xi32, #tpu.memory_space<vmem>>, %arg3: memref<128x512xf32, #tpu.memory_space<vmem>>, %arg4: memref<128x512xf32, #tpu.memory_space<vmem>>, %arg5: memref<128x512xf32, #tpu.memory_space<vmem>>) attributes {dimension_semantics = [#tpu.dimension_semantics<parallel>, #tpu.dimension_semantics<parallel>], iteration_bounds = array<i64: 2, 2>, scalar_prefetch = 0 : i64, scratch_operands = 0 : i64, tpu.core_type = #tpu.core_type<tc>, window_params = [{transform_indices = @transform_0, window_bounds = array<i64: 128, 512>}, {transform_indices = @transform_1, window_bounds = array<i64: 128, 512>}, {transform_indices = @transform_2, window_bounds = array<i64: 128, 512>}, {transform_indices = @transform_3, window_bounds = array<i64: 128, 512>}]} {
    %c0 = arith.constant 0 : index
    %c0_0 = arith.constant 0 : index
    %0 = vector.load %arg2[%c0, %c0_0] : memref<128x512xi32, #tpu.memory_space<vmem>>, vector<128x512xi32>
    %c1_i32 = arith.constant 1 : i32
    %1 = vector.broadcast %c1_i32 : i32 to vector<128x512xi32>
    %2 = arith.andi %0, %1 : vector<128x512xi32>
    %c0_i32 = arith.constant 0 : i32
    %3 = vector.broadcast %c0_i32 : i32 to vector<128x512xi32>
    %4 = arith.cmpi ne, %2, %3 : vector<128x512xi32>
    %c2_i32 = arith.constant 2 : i32
    %5 = vector.broadcast %c2_i32 : i32 to vector<128x512xi32>
    %6 = arith.andi %0, %5 : vector<128x512xi32>
    %c0_i32_1 = arith.constant 0 : i32
    %7 = vector.broadcast %c0_i32_1 : i32 to vector<128x512xi32>
    %8 = arith.cmpi ne, %6, %7 : vector<128x512xi32>
    %c0_2 = arith.constant 0 : index
    %c0_3 = arith.constant 0 : index
    %9 = vector.load %arg3[%c0_2, %c0_3] : memref<128x512xf32, #tpu.memory_space<vmem>>, vector<128x512xf32>
    %c0_4 = arith.constant 0 : index
    %c0_5 = arith.constant 0 : index
    %10 = vector.load %arg4[%c0_4, %c0_5] : memref<128x512xf32, #tpu.memory_space<vmem>>, vector<128x512xf32>
    %cst = arith.constant 0.000000e+00 : f32
    %11 = vector.broadcast %cst : f32 to vector<128x512xf32>
    %12 = arith.select %4, %9, %11 : vector<128x512xi1>, vector<128x512xf32>
    %cst_6 = arith.constant 0.000000e+00 : f32
    %13 = vector.broadcast %cst_6 : f32 to vector<128x512xf32>
    %14 = arith.select %8, %10, %13 : vector<128x512xi1>, vector<128x512xf32>
    %15 = arith.addf %12, %14 : vector<128x512xf32>
    %cst_7 = arith.constant 2.000000e+00 : f32
    %16 = vector.broadcast %cst_7 : f32 to vector<128x512xf32>
    %17 = arith.mulf %15, %16 : vector<128x512xf32>
    %c0_8 = arith.constant 0 : index
    %c0_9 = arith.constant 0 : index
    %18 = vector.load %arg5[%c0_8, %c0_9] : memref<128x512xf32, #tpu.memory_space<vmem>>, vector<128x512xf32>
    tpu.vector_store %arg5[%c0_8, %c0_9], %17 {strides = array<i32>} : memref<128x512xf32, #tpu.memory_space<vmem>>, vector<128x512xf32>,
    return
  }
  func.func @transform_0(%arg0: i32, %arg1: i32) -> (i32, i32) {
    %c0_i32 = arith.constant 0 : i32
    return %arg0, %arg1 : i32, i32
  }
  func.func @transform_1(%arg0: i32, %arg1: i32) -> (i32, i32) {
    %c0_i32 = arith.constant 0 : i32
    return %arg0, %arg1 : i32, i32
  }
  func.func @transform_2(%arg0: i32, %arg1: i32) -> (i32, i32) {
    %c0_i32 = arith.constant 0 : i32
    return %arg0, %arg1 : i32, i32
  }
  func.func @transform_3(%arg0: i32, %arg1: i32) -> (i32, i32) {
    %c0_i32 = arith.constant 0 : i32
    return %arg0, %arg1 : i32, i32
  }
}

</mosaic_0001>

<bundles_post_ra>
// kernel: tpu_custom_call.1
= control target key start
LH: loop header
LB: loop body
LE: loop exit
PB: predicated region body
PF: predicated region fallthrough
CT: control target
= control target key end

     0   :  { %s2201_s0 = inlined_call_operand.hbm [shape: u32[256,1024], index: 0, kind: input, shape index: {}]   ;;  %s2202_s1 = inlined_call_operand.hbm [shape: f32[256,1024], index: 1, kind: input, shape index: {}]   ;;  %s2203_s2 = inlined_call_operand.hbm [shape: f32[256,1024], index: 2, kind: input, shape index: {}]   ;;  %s2204_s3 = inlined_call_operand.hbm [shape: f32[256,1024], index: 3, kind: output, shape index: {}]  }
   0x1   :  { %2214 = sst [smem:[#allocation21_spill]] %s2202_s1 }
   0x2   :  { %8 = vsyncpa [#allocation3], 0 }
   0x3   :  { %10 = vsyncpa [#allocation3 + $0x1], 0 }
   0x4   :  { %11 = vsyncpa [#allocation6], 0 }
   0x5   :  { %13 = vsyncpa [#allocation6 + $0x1], 0 }
   0x6   :  { %14 = vsyncpa [#allocation4], 0 }
   0x7   :  { %16 = vsyncpa [#allocation4 + $0x1], 0  ;;  %s1584_s12 = smov 0   ;;  %s1586_s13 = smov 0  }
   0x8   :  { %s1588_s14 = smov 0   ;;  %s1590_s15 = smov 0  }
   0x9   :  { %s1592_s16 = smov 0   ;;  %s1594_s17 = smov 0  }
   0xa   :  { %s1596_s18 = smov 0   ;;  %s1598_s19 = smov 0  }
   0xb LB: > { %2215 = sst [smem:[#allocation12_spill]] %s1528_s12  ;;  %s1625_s20 = sadd.s32 4294967295, %s1556_s19   ;;  %s1556_s19 = sphi %s1598_s19, %s22_s19   ;;  %s1552_s18 = sphi %s1596_s18, %s2293_s18   ;;  %s1548_s17 = sphi %s1594_s17, %s2292_s17   ;;  %s1544_s16 = sphi %s1592_s16, %s2291_s16   ;;  %s1540_s15 = sphi %s1590_s15, %s2290_s15   ;;  %s1536_s14 = sphi %s1588_s14, %s2289_s14   ;;  %s1532_s13 = sphi %s1586_s13, %s2295_s13   ;;  %s1528_s12 = sphi %s1584_s12, %s2294_s12  }
   0xc   : > { %2216 = sst [smem:[#allocation13_spill]] %s1536_s14  ;;  %s1236_s21 = sadd.s32 4294967294, %s1556_s19  }
   0xd   : > { %2217 = sst [smem:[#allocation14_spill]] %s1548_s17  ;;  %s31_s22 = sadd.s32 1, %s1548_s17 }
   0xe   : > { %2218 = sst [smem:[#allocation15_spill]] %s1552_s18  ;;  %s34_s23 = sadd.s32 1, %s1552_s18 }
   0xf   : > { %2219 = sst [smem:[#allocation16_spill]] %s1556_s19  ;;  %p32_p0 = scmp.ge.s32.totalorder %s31_s22, 2 }
  0x10   : > { %s43_s24 = sadd.s32 1, %s1536_s14  ;;  %p50_p1 = scmp.ne.s32.totalorder %s1536_s14, %s1532_s13 }
  0x11   : > { %p51_p2 = scmp.eq.s32.totalorder %s1556_s19, 0  ;;  %s2297_s22 = smov (%p32_p0, %s31_s22), 0 }
  0x12   : > { %2220 = sst [smem:[#allocation17_spill]] %s2297_s22  ;;  %s2299_s23 = smov (!%p32_p0, %s34_s23), %s1552_s18 }
  0x13   : > { %s39_s25 = ssub.s32 %s1548_s17, %s2297_s22  ;;  %p1639_p3 = por %p51_p2, %p50_p1 }
  0x14   : > { %p36_p4 = scmp.ge.s32.totalorder %s2299_s23, 2  ;;  %p56_p5 = scmp.ne.s32.totalorder %s1532_s13, %s1528_s12 }
  0x15   : > { %p57_p6 = scmp.eq.s32.totalorder %s1625_s20, 0  ;;  %p138_p7 = scmp.eq.s32.totalorder %s1625_s20, 3 }
  0x16   : > { %s2301_s23 = smov (%p36_p4, %s2299_s23), 0  ;;  %p144_p10 = scmp.eq.s32.totalorder %s1236_s21, 3 }
  0x17   : > { %2222 = sst [smem:[#allocation18_spill]] %s2301_s23  ;;  %p1649_p8 = por %p57_p6, %p56_p5 }
  0x18   : > { %p1653_p9 = por %p138_p7, %p50_p1  ;;  %s38_s29 = ssub.s32 %s1552_s18, %s2301_s23 }
  0x19   : > { %s40_s30 = sor.u32 %s39_s25, %s38_s29  ;;  %p1659_p12 = por %p144_p10, %p56_p5 }
  0x1a   : > { %p41_p11 = scmp.eq.s32.totalorder %s40_s30, 0  ;;  %p1292_p13 = scmp.lt.s32.totalorder %s1556_s19, 4 }
  0x1b   : > { %s2225_s4 = scalar_select %p1659_p12, 1, 0 }
  0x1c   : > { %s164_s5 = sand.u32 1, %s1536_s14   ;;  %s1241_s8 = sshll.u32 %s1548_s17, 2 }
  0x1d   : > { %2226 = sst [smem:[#allocation19_spill]] %s2225_s4  ;;  %s1668_s7 = sshll.u32 %s164_s5, 9 }
  0x1e   : > { %s1666_s6 = scalar_select %p41_p11, %s1536_s14, %s43_s24  }
  0x1f   : > { %s1266_s9 = sshll.u32 %s1552_s18, 7  ;;  %p1674_p0 = pnand %p1292_p13, %p1639_p3 }
  0x20   : > { %2227 = sst [smem:[#allocation20_spill]] %s1666_s6  ;;  %s174_s11 = sadd.s32 %s1266_s9, %s1241_s8 }
  0x21   : > { %s1243_s21 = sshll.u32 %s174_s11, 3  ;;  %s189_s25 = sand.u32 1, %s1556_s19  }
  0x22   : > { %s2229_s1 = sld [smem:[#allocation21_spill]]  ;;  %s193_s22 = scalar_lea.vmem [#allocation5], %s1668_s7 }
  0x23   : > { %s204_s17 = sshll.u32 %s193_s22, 4  ;;  %s190_s26 = scalar_lea.sflag [#allocation6], %s189_s25  ;;  %s205_s17 = int_to_ptr.vmem [resolvable:$true] %s204_s17 }
  0x24   : > { %s1558_s18 = smov 1024   ;;  %s1559_s6 = smov 512  }
  0x25   : > { %s1560_s14 = smov 32   ;;  %p1254_p1 = scmp.ge.s32.totalorder %s1556_s19, 1 }
  0x26   : > { %p237_p2 = scmp.lt.s32.totalorder %s1556_s19, 5  ;;  %s176_s22 = scalar_lea.hbm %s2201_s0, %s1243_s21 }
  0x27   : > { %s177_s29 = sshll.u32 %s176_s22, 4  ;;  %s168_s30 = scalar_lea.vmem [#allocation2], %s1668_s7  ;;  %s178_s29 = int_to_ptr.hbm [resolvable:$true] %s177_s29 }
  0x28   : > { %s201_s24 = scalar_lea.hbm %s2229_s1, %s1243_s21  ;;  %p1687_p3 = pnand %p1254_p1, %p237_p2 }
  0x29   : > { %s202_s23 = sshll.u32 %s201_s24, 4  ;;  %s179_s25 = sshll.u32 %s168_s30, 4  ;;  %s203_s23 = int_to_ptr.hbm [resolvable:$true] %s202_s23  ;;  %s180_s25 = int_to_ptr.vmem [resolvable:$true] %s179_s25 }
  0x2a   : > { %1284 = dma.hbm_to_vmem [thread:$0]  (!%p1674_p0), %s203_s23, 8192, %s205_s17, %s190_s26, %s1558_s18, %s1559_s6, %s1560_s14  }
  0x2b   : > { %s165_s24 = scalar_lea.sflag [#allocation3], %s164_s5  ;;  %s226_s1 = scalar_lea.hbm %s2203_s2, %s1243_s21 }
  0x2c   : > { %1281 = dma.hbm_to_vmem [thread:$0]  (!%p1674_p0), %s178_s29, 8192, %s180_s25, %s165_s24, %s1558_s18, %s1559_s6, %s1560_s14  }
  0x2d   : > { %s227_s4 = sshll.u32 %s226_s1, 4  ;;  %s218_s12 = scalar_lea.vmem [#allocation7], %s1668_s7  ;;  %s228_s4 = int_to_ptr.hbm [resolvable:$true] %s227_s4 }
  0x2e   : > { %s229_s19 = sshll.u32 %s218_s12, 4  ;;  %241 = sbr.rel (%p1687_p3) target bundleno = 195 (0xc3), region = 32  ;;  %s230_s19 = int_to_ptr.vmem [resolvable:$true] %s229_s19 }
  0x2f   : > { %1287 = dma.hbm_to_vmem [thread:$0]  (!%p1674_p0), %s228_s4, 8192, %s230_s19, %s190_s26, %s1558_s18, %s1559_s6, %s1560_s14  }
  0x30   : > { %s1706_s9 = sand.u32 (!%p1687_p3), 1, %s1532_s13  }
  0x31   : > { %s1709_s5 = sshll.u32 (!%p1687_p3), %s1706_s9, 9  ;;  %s244_s21 = scalar_lea.sflag (!%p1687_p3), [#allocation3], %s1706_s9 }
  0x32   : > { %s1713_s1 = scalar_lea.vmem (!%p1687_p3), [#allocation2], %s1709_s5 }
  0x33   : > { %1515 = dma.done.wait (%p1649_p8), %s244_s21, 8192  }
  0x34   : > { %1517 = vsyncadd (%p1649_p8), %s244_s21, 4294959104  ;;  %s253_s12 = sand.u32 1, %s1625_s20   ;;  %s1721_s18 = scalar_lea.vmem [#allocation5], %s1709_s5 }
  0x35   : > { %s254_s14 = scalar_lea.sflag [#allocation6], %s253_s12 }
  0x36   : > { %1519 = dma.done.wait (%p1649_p8), %s254_s14, 16384  }
  0x37   : > { %1521 = vsyncadd (%p1649_p8), %s254_s14, 4294950912  ;;  %v309_v0 = vld [vmem:[%s1713_s1] sm:$0xff]  ;;  %s1730_s19 = scalar_lea.vmem [#allocation7], %s1709_s5  ;;  %v310_v5 = vld [vmem:[%s1713_s1 + $0x8] sm:$0xff]  ;;  %s1751_s20 = scalar_lea.vmem [#allocation8], %s1709_s5 }
  0x38   : > { %v373_v1 = vand.u32 1, %v309_v0  ;;  %v501_v2 = vand.u32 2, %v309_v0  ;;  %v629_v3 = vld [vmem:[%s1721_s18] sm:$0xff]  ;;  %v374_v6 = vand.u32 1, %v310_v5  ;;  %v502_v7 = vand.u32 2, %v310_v5  ;;  %v630_v8 = vld [vmem:[%s1721_s18 + $0x8] sm:$0xff] }
  0x39   : > { %v693_v4 = vld [vmem:[%s1730_s19] sm:$0xff]  ;;  %v694_v9 = vld [vmem:[%s1730_s19 + $0x8] sm:$0xff]  ;;  %v311_v10 = vld [vmem:[%s1713_s1 + $0x10] sm:$0xff]  ;;  %s1261_s27 = sshll.u32 %s1540_s15, 2  ;;  %s1269_s4 = sshll.u32 %s1544_s16, 7 }
  0x3a   : > { %vm437_vm0 = vcmp.ne.s32.totalorder %v373_v1, 0  ;;  %vm565_vm1 = vcmp.ne.s32.totalorder %v501_v2, 0  ;;  %v375_v11 = vand.u32 1, %v311_v10  ;;  %v503_v12 = vand.u32 2, %v311_v10  ;;  %v631_v13 = vld [vmem:[%s1721_s18 + $0x10] sm:$0xff]  ;;  %v312_v14 = vld [vmem:[%s1713_s1 + $0x18] sm:$0xff]  ;;  %s2120_s15 = sadd.s32 %s1269_s4, %s1261_s27 }
  0x3b   : > { %v757_v15 = vsel %vm437_vm0, %v629_v3, 0.0  ;;  %v821_v16 = vsel %vm565_vm1, %v693_v4, 0.0  ;;  %vm438_vm2 = vcmp.ne.s32.totalorder %v374_v6, 0  ;;  %vm566_vm3 = vcmp.ne.s32.totalorder %v502_v7, 0  ;;  %v695_v17 = vld [vmem:[%s1730_s19 + $0x10] sm:$0xff]  ;;  %v313_v18 = vld [vmem:[%s1713_s1 + $0x20] sm:$0xff] }
  0x3c   : > { %v885_v19 = vadd.f32 %v821_v16, %v757_v15  ;;  %v758_v20 = vsel %vm438_vm2, %v630_v8, 0.0  ;;  %v822_v21 = vsel %vm566_vm3, %v694_v9, 0.0  ;;  %vm439_vm4 = vcmp.ne.s32.totalorder %v375_v11, 0  ;;  %v632_v25 = vld [vmem:[%s1721_s18 + $0x18] sm:$0xff]  ;;  %v314_v26 = vld [vmem:[%s1713_s1 + $0x28] sm:$0xff]  ;;  %v633_v32 = vld [vmem:[%s1721_s18 + $0x20] sm:$0xff] }
  0x3d   : > { %v886_v22 = vadd.f32 %v822_v21, %v758_v20  ;;  %vm567_vm5 = vcmp.ne.s32.totalorder %v503_v12, 0  ;;  %v759_v23 = vsel %vm439_vm4, %v631_v13, 0.0  ;;  %v376_v24 = vand.u32 1, %v312_v14  ;;  %v696_v30 = vld [vmem:[%s1730_s19 + $0x18] sm:$0xff]  ;;  %v697_v37 = vld [vmem:[%s1730_s19 + $0x20] sm:$0xff]  ;;  %v634_v41 = vld [vmem:[%s1721_s18 + $0x28] sm:$0xff] }
  0x3e   : > { %v949_v27 = vmul.f32 2.0, %v885_v19  ;;  %v823_v28 = vsel %vm567_vm5, %v695_v17, 0.0  ;;  %v504_v29 = vand.u32 2, %v312_v14  ;;  %v377_v31 = vand.u32 1, %v313_v18  ;;  %v315_v42 = vld [vmem:[%s1713_s1 + $0x30] sm:$0xff]  ;;  %v316_v46 = vld [vmem:[%s1713_s1 + $0x38] sm:$0xff] }
  0x3f   : > { %v950_v33 = vmul.f32 2.0, %v886_v22  ;;  %v887_v34 = vadd.f32 %v823_v28, %v759_v23  ;;  %vm1745_vm6 = vcmp.ne.s32.totalorder %v376_v24, 0  ;;  %v505_v36 = vand.u32 2, %v313_v18  ;;  %v698_v51 = vld [vmem:[%s1730_s19 + $0x28] sm:$0xff]  ;;  %v635_v56 = vld [vmem:[%s1721_s18 + $0x30] sm:$0xff]  ;;  %v636_v61 = vld [vmem:[%s1721_s18 + $0x38] sm:$0xff] }
  0x40   : > { %1013 = vst [vmem:[%s1751_s20] sm:$0xff] %v949_v27  ;;  %vm568_vm7 = vcmp.ne.s32.totalorder %v504_v29, 0  ;;  %v760_v38 = vsel %vm1745_vm6, %v632_v25, 0.0  ;;  %vm1756_vm8 = vcmp.ne.s32.totalorder %v377_v31, 0  ;;  %v378_v40 = vand.u32 1, %v314_v26  ;;  %v699_v57 = vld [vmem:[%s1730_s19 + $0x30] sm:$0xff]  ;;  %v317_v62 = vld [vmem:[%s1713_s1 + $0x40] sm:$0xff] }
  0x41   : > { %1014 = vst [vmem:[%s1751_s20 + $0x8] sm:$0xff] %v950_v33  ;;  %v951_v43 = vmul.f32 2.0, %v887_v34  ;;  %v824_v44 = vsel %vm568_vm7, %v696_v30, 0.0  ;;  %vm569_vm9 = vcmp.ne.s32.totalorder %v505_v36, 0  ;;  %v761_v45 = vsel %vm1756_vm8, %v633_v32, 0.0  ;;  %v700_v1 = vld [vmem:[%s1730_s19 + $0x38] sm:$0xff] }
  0x42   : > { %v888_v47 = vadd.f32 %v824_v44, %v760_v38  ;;  %v825_v48 = vsel %vm569_vm9, %v697_v37, 0.0  ;;  %vm1766_vm10 = vcmp.ne.s32.totalorder %v378_v40, 0  ;;  %v506_v50 = vand.u32 2, %v314_v26  ;;  %v318_v2 = vld [vmem:[%s1713_s1 + $0x48] sm:$0xff]  ;;  %v637_v9 = vld [vmem:[%s1721_s18 + $0x40] sm:$0xff]  ;;  %v319_v10 = vld [vmem:[%s1713_s1 + $0x50] sm:$0xff] }
  0x43   : > { %1015 = vst [vmem:[%s1751_s20 + $0x10] sm:$0xff] %v951_v43  ;;  %v889_v52 = vadd.f32 %v825_v48, %v761_v45  ;;  %v762_v53 = vsel %vm1766_vm10, %v634_v41, 0.0  ;;  %v379_v54 = vand.u32 1, %v315_v42  ;;  %v507_v55 = vand.u32 2, %v315_v42  ;;  %v701_v14 = vld [vmem:[%s1730_s19 + $0x40] sm:$0xff]  ;;  %v638_v16 = vld [vmem:[%s1721_s18 + $0x48] sm:$0xff] }
  0x44   : > { %v952_v58 = vmul.f32 2.0, %v888_v47  ;;  %vm570_vm11 = vcmp.ne.s32.totalorder %v506_v50, 0  ;;  %v380_v59 = vand.u32 1, %v316_v46  ;;  %v508_v60 = vand.u32 2, %v316_v46  ;;  %v702_v21 = vld [vmem:[%s1730_s19 + $0x48] sm:$0xff]  ;;  %v639_v22 = vld [vmem:[%s1721_s18 + $0x50] sm:$0xff] }
  0x45   : > { %v953_v63 = vmul.f32 2.0, %v889_v52  ;;  %v826_v0 = vsel %vm570_vm11, %v698_v51, 0.0  ;;  %vm443_vm12 = vcmp.ne.s32.totalorder %v379_v54, 0  ;;  %vm571_vm13 = vcmp.ne.s32.totalorder %v507_v55, 0  ;;  %v320_v25 = vld [vmem:[%s1713_s1 + $0x58] sm:$0xff]  ;;  %v321_v29 = vld [vmem:[%s1713_s1 + $0x60] sm:$0xff] }
  0x46   : > { %1016 = vst [vmem:[%s1751_s20 + $0x18] sm:$0xff] %v952_v58  ;;  %v890_v3 = vadd.f32 %v826_v0, %v762_v53  ;;  %v763_v4 = vsel %vm443_vm12, %v635_v56, 0.0  ;;  %v827_v5 = vsel %vm571_vm13, %v699_v57, 0.0  ;;  %vm444_vm14 = vcmp.ne.s32.totalorder %v380_v59, 0  ;;  %v703_v34 = vld [vmem:[%s1730_s19 + $0x50] sm:$0xff]  ;;  %v640_v39 = vld [vmem:[%s1721_s18 + $0x58] sm:$0xff] }
  0x47   : > { %1017 = vst [vmem:[%s1751_s20 + $0x20] sm:$0xff] %v953_v63  ;;  %v891_v6 = vadd.f32 %v827_v5, %v763_v4  ;;  %vm572_vm15 = vcmp.ne.s32.totalorder %v508_v60, 0  ;;  %v764_v7 = vsel %vm444_vm14, %v636_v61, 0.0  ;;  %v381_v8 = vand.u32 1, %v317_v62  ;;  %v704_v40 = vld [vmem:[%s1730_s19 + $0x58] sm:$0xff]  ;;  %v641_v44 = vld [vmem:[%s1721_s18 + $0x60] sm:$0xff] }
  0x48   : > { %v954_v11 = vmul.f32 2.0, %v890_v3  ;;  %v828_v12 = vsel %vm572_vm15, %v700_v1, 0.0  ;;  %v509_v13 = vand.u32 2, %v317_v62  ;;  %v382_v15 = vand.u32 1, %v318_v2  ;;  %v322_v45 = vld [vmem:[%s1713_s1 + $0x68] sm:$0xff]  ;;  %v705_v48 = vld [vmem:[%s1730_s19 + $0x60] sm:$0xff] }
  0x49   : > { %v955_v17 = vmul.f32 2.0, %v891_v6  ;;  %v892_v18 = vadd.f32 %v828_v12, %v764_v7  ;;  %vm1786_vm0 = vcmp.ne.s32.totalorder %v381_v8, 0  ;;  %v510_v20 = vand.u32 2, %v318_v2  ;;  %v323_v49 = vld [vmem:[%s1713_s1 + $0x70] sm:$0xff]  ;;  %v642_v56 = vld [vmem:[%s1721_s18 + $0x68] sm:$0xff]  ;;  %v324_v57 = vld [vmem:[%s1713_s1 + $0x78] sm:$0xff] }
  0x4a   : > { %1018 = vst [vmem:[%s1751_s20 + $0x28] sm:$0xff] %v954_v11  ;;  %vm573_vm1 = vcmp.ne.s32.totalorder %v509_v13, 0  ;;  %v765_v23 = vsel %vm1786_vm0, %v637_v9, 0.0  ;;  %vm446_vm2 = vcmp.ne.s32.totalorder %v382_v15, 0  ;;  %v383_v24 = vand.u32 1, %v319_v10  ;;  %v706_v61 = vld [vmem:[%s1730_s19 + $0x68] sm:$0xff] }
  0x4b   : > { %1019 = vst [vmem:[%s1751_s20 + $0x30] sm:$0xff] %v955_v17  ;;  %v956_v26 = vmul.f32 2.0, %v892_v18  ;;  %v829_v27 = vsel %vm573_vm1, %v701_v14, 0.0  ;;  %vm574_vm3 = vcmp.ne.s32.totalorder %v510_v20, 0  ;;  %v766_v28 = vsel %vm446_vm2, %v638_v16, 0.0  ;;  %v643_v63 = vld [vmem:[%s1721_s18 + $0x70] sm:$0xff] }
  0x4c   : > { %v893_v30 = vadd.f32 %v829_v27, %v765_v23  ;;  %v830_v31 = vsel %vm574_vm3, %v702_v21, 0.0  ;;  %vm1798_vm4 = vcmp.ne.s32.totalorder %v383_v24, 0  ;;  %v511_v33 = vand.u32 2, %v319_v10  ;;  %v707_v4 = vld [vmem:[%s1730_s19 + $0x70] sm:$0xff]  ;;  %v644_v5 = vld [vmem:[%s1721_s18 + $0x78] sm:$0xff]  ;;  %v325_v8 = vld [vmem:[%s1713_s1 + $0x80] sm:$0xff] }
  0x4d   : > { %1020 = vst [vmem:[%s1751_s20 + $0x38] sm:$0xff] %v956_v26  ;;  %v894_v35 = vadd.f32 %v830_v31, %v766_v28  ;;  %v767_v36 = vsel %vm1798_vm4, %v639_v22, 0.0  ;;  %v384_v37 = vand.u32 1, %v320_v25  ;;  %v512_v38 = vand.u32 2, %v320_v25  ;;  %v326_v12 = vld [vmem:[%s1713_s1 + $0x88] sm:$0xff]  ;;  %v708_v17 = vld [vmem:[%s1730_s19 + $0x78] sm:$0xff] }
  0x4e   : > { %v957_v41 = vmul.f32 2.0, %v893_v30  ;;  %vm575_vm5 = vcmp.ne.s32.totalorder %v511_v33, 0  ;;  %v385_v42 = vand.u32 1, %v321_v29  ;;  %v513_v43 = vand.u32 2, %v321_v29  ;;  %v645_v22 = vld [vmem:[%s1721_s18 + $0x80] sm:$0xff]  ;;  %v646_v27 = vld [vmem:[%s1721_s18 + $0x88] sm:$0xff] }
  0x4f   : > { %v958_v46 = vmul.f32 2.0, %v894_v35  ;;  %v831_v47 = vsel %vm575_vm5, %v703_v34, 0.0  ;;  %vm448_vm6 = vcmp.ne.s32.totalorder %v384_v37, 0  ;;  %vm576_vm7 = vcmp.ne.s32.totalorder %v512_v38, 0  ;;  %v709_v23 = vld [vmem:[%s1730_s19 + $0x80] sm:$0xff]  ;;  %v327_v28 = vld [vmem:[%s1713_s1 + $0x90] sm:$0xff] }
  0x50   : > { %1021 = vst [vmem:[%s1751_s20 + $0x40] sm:$0xff] %v957_v41  ;;  %v895_v50 = vadd.f32 %v831_v47, %v767_v36  ;;  %v768_v51 = vsel %vm448_vm6, %v640_v39, 0.0  ;;  %v832_v52 = vsel %vm576_vm7, %v704_v40, 0.0  ;;  %vm449_vm8 = vcmp.ne.s32.totalorder %v385_v42, 0  ;;  %v710_v31 = vld [vmem:[%s1730_s19 + $0x88] sm:$0xff]  ;;  %v328_v32 = vld [vmem:[%s1713_s1 + $0x98] sm:$0xff] }
  0x51   : > { %1022 = vst [vmem:[%s1751_s20 + $0x48] sm:$0xff] %v958_v46  ;;  %v896_v53 = vadd.f32 %v832_v52, %v768_v51  ;;  %vm577_vm9 = vcmp.ne.s32.totalorder %v513_v43, 0  ;;  %v769_v54 = vsel %vm449_vm8, %v641_v44, 0.0  ;;  %v386_v55 = vand.u32 1, %v322_v45  ;;  %v647_v39 = vld [vmem:[%s1721_s18 + $0x90] sm:$0xff]  ;;  %v329_v40 = vld [vmem:[%s1713_s1 + $0xa0] sm:$0xff] }
  0x52   : > { %v959_v58 = vmul.f32 2.0, %v895_v50  ;;  %v833_v59 = vsel %vm577_vm9, %v705_v48, 0.0  ;;  %v514_v60 = vand.u32 2, %v322_v45  ;;  %v387_v62 = vand.u32 1, %v323_v49  ;;  %v711_v44 = vld [vmem:[%s1730_s19 + $0x90] sm:$0xff]  ;;  %v648_v46 = vld [vmem:[%s1721_s18 + $0x98] sm:$0xff] }
  0x53   : > { %v960_v0 = vmul.f32 2.0, %v896_v53  ;;  %v897_v1 = vadd.f32 %v833_v59, %v769_v54  ;;  %vm1818_vm10 = vcmp.ne.s32.totalorder %v386_v55, 0  ;;  %v515_v3 = vand.u32 2, %v323_v49  ;;  %v712_v51 = vld [vmem:[%s1730_s19 + $0x98] sm:$0xff]  ;;  %v649_v52 = vld [vmem:[%s1721_s18 + $0xa0] sm:$0xff]  ;;  %v330_v55 = vld [vmem:[%s1713_s1 + $0xa8] sm:$0xff] }
  0x54   : > { %1023 = vst [vmem:[%s1751_s20 + $0x50] sm:$0xff] %v959_v58  ;;  %vm578_vm11 = vcmp.ne.s32.totalorder %v514_v60, 0  ;;  %v770_v6 = vsel %vm1818_vm10, %v642_v56, 0.0  ;;  %vm451_vm12 = vcmp.ne.s32.totalorder %v387_v62, 0  ;;  %v388_v7 = vand.u32 1, %v324_v57  ;;  %v331_v59 = vld [vmem:[%s1713_s1 + $0xb0] sm:$0xff] }
  0x55   : > { %1024 = vst [vmem:[%s1751_s20 + $0x58] sm:$0xff] %v960_v0  ;;  %v961_v9 = vmul.f32 2.0, %v897_v1  ;;  %v834_v10 = vsel %vm578_vm11, %v706_v61, 0.0  ;;  %vm579_vm13 = vcmp.ne.s32.totalorder %v515_v3, 0  ;;  %v771_v11 = vsel %vm451_vm12, %v643_v63, 0.0  ;;  %v713_v0 = vld [vmem:[%s1730_s19 + $0xa0] sm:$0xff] }
  0x56   : > { %v898_v13 = vadd.f32 %v834_v10, %v770_v6  ;;  %v835_v14 = vsel %vm579_vm13, %v707_v4, 0.0  ;;  %vm1830_vm14 = vcmp.ne.s32.totalorder %v388_v7, 0  ;;  %v516_v16 = vand.u32 2, %v324_v57  ;;  %v714_v6 = vld [vmem:[%s1730_s19 + $0xa8] sm:$0xff]  ;;  %v651_v10 = vld [vmem:[%s1721_s18 + $0xb0] sm:$0xff]  ;;  %v333_v15 = vld [vmem:[%s1713_s1 + $0xc0] sm:$0xff] }
  0x57   : > { %1025 = vst [vmem:[%s1751_s20 + $0x60] sm:$0xff] %v961_v9  ;;  %v899_v18 = vadd.f32 %v835_v14, %v771_v11  ;;  %v772_v19 = vsel %vm1830_vm14, %v644_v5, 0.0  ;;  %v389_v20 = vand.u32 1, %v325_v8  ;;  %v517_v21 = vand.u32 2, %v325_v8  ;;  %v650_v5 = vld [vmem:[%s1721_s18 + $0xa8] sm:$0xff]  ;;  %v332_v11 = vld [vmem:[%s1713_s1 + $0xb8] sm:$0xff] }
  0x58   : > { %v962_v24 = vmul.f32 2.0, %v898_v13  ;;  %vm580_vm15 = vcmp.ne.s32.totalorder %v516_v16, 0  ;;  %v390_v25 = vand.u32 1, %v326_v12  ;;  %v518_v26 = vand.u32 2, %v326_v12  ;;  %v715_v14 = vld [vmem:[%s1730_s19 + $0xb0] sm:$0xff]  ;;  %v338_v62 = vld [vmem:[%s1713_s1 + $0xe8] sm:$0xff] }
  0x59   : > { %v963_v29 = vmul.f32 2.0, %v899_v18  ;;  %v836_v30 = vsel %vm580_vm15, %v708_v17, 0.0  ;;  %vm453_vm0 = vcmp.ne.s32.totalorder %v389_v20, 0  ;;  %vm581_vm1 = vcmp.ne.s32.totalorder %v517_v21, 0  ;;  %s1263_s16 = sshll.u32 %s2120_s15, 3  ;;  %s1093_s26 = sshll.u32 %s1751_s20, 4  ;;  %s1094_s26 = int_to_ptr.vmem [resolvable:$true] %s1093_s26 }
  0x5a   : > { %1026 = vst [vmem:[%s1751_s20 + $0x68] sm:$0xff] %v962_v24  ;;  %v900_v33 = vadd.f32 %v836_v30, %v772_v19  ;;  %v773_v34 = vsel %vm453_vm0, %v645_v22, 0.0  ;;  %v837_v35 = vsel %vm581_vm1, %v709_v23, 0.0  ;;  %vm454_vm2 = vcmp.ne.s32.totalorder %v390_v25, 0  ;;  %v652_v22 = vld [vmem:[%s1721_s18 + $0xb8] sm:$0xff]  ;;  %v334_v23 = vld [vmem:[%s1713_s1 + $0xc8] sm:$0xff]  ;;  %s1092_s10 = scalar_lea.hbm %s2204_s3, %s1263_s16 }
  0x5b   : > { %1027 = vst [vmem:[%s1751_s20 + $0x70] sm:$0xff] %v963_v29  ;;  %v901_v36 = vadd.f32 %v837_v35, %v773_v34  ;;  %vm582_vm3 = vcmp.ne.s32.totalorder %v518_v26, 0  ;;  %v774_v37 = vsel %vm454_vm2, %v646_v27, 0.0  ;;  %v391_v38 = vand.u32 1, %v327_v28  ;;  %v716_v27 = vld [vmem:[%s1730_s19 + $0xb8] sm:$0xff]  ;;  %v653_v29 = vld [vmem:[%s1721_s18 + $0xc0] sm:$0xff] }
  0x5c   : > { %v964_v41 = vmul.f32 2.0, %v900_v33  ;;  %v838_v42 = vsel %vm582_vm3, %v710_v31, 0.0  ;;  %v519_v43 = vand.u32 2, %v327_v28  ;;  %v392_v45 = vand.u32 1, %v328_v32  ;;  %v717_v34 = vld [vmem:[%s1730_s19 + $0xc0] sm:$0xff]  ;;  %v654_v35 = vld [vmem:[%s1721_s18 + $0xc8] sm:$0xff] }
  0x5d   : > { %v965_v47 = vmul.f32 2.0, %v901_v36  ;;  %v902_v48 = vadd.f32 %v838_v42, %v774_v37  ;;  %vm1850_vm4 = vcmp.ne.s32.totalorder %v391_v38, 0  ;;  %v520_v50 = vand.u32 2, %v328_v32  ;;  %v335_v38 = vld [vmem:[%s1713_s1 + $0xd0] sm:$0xff]  ;;  %v336_v42 = vld [vmem:[%s1713_s1 + $0xd8] sm:$0xff]  ;;  %s1095_s8 = sshll.u32 %s1092_s10, 4  ;;  %s1096_s8 = int_to_ptr.hbm [resolvable:$true] %s1095_s8 }
  0x5e   : > { %1028 = vst [vmem:[%s1751_s20 + $0x78] sm:$0xff] %v964_v41  ;;  %vm583_vm5 = vcmp.ne.s32.totalorder %v519_v43, 0  ;;  %v775_v53 = vsel %vm1850_vm4, %v647_v39, 0.0  ;;  %vm456_vm6 = vcmp.ne.s32.totalorder %v392_v45, 0  ;;  %v393_v54 = vand.u32 1, %v329_v40  ;;  %v343_v45 = vld [vmem:[%s1713_s1 + $0x110] sm:$0xff] }
  0x5f   : > { %1029 = vst [vmem:[%s1751_s20 + $0x80] sm:$0xff] %v965_v47  ;;  %v966_v56 = vmul.f32 2.0, %v902_v48  ;;  %v839_v57 = vsel %vm583_vm5, %v711_v44, 0.0  ;;  %vm584_vm7 = vcmp.ne.s32.totalorder %v520_v50, 0  ;;  %v776_v58 = vsel %vm456_vm6, %v648_v46, 0.0  ;;  %v718_v47 = vld [vmem:[%s1730_s19 + $0xc8] sm:$0xff] }
  0x60   : > { %v903_v60 = vadd.f32 %v839_v57, %v775_v53  ;;  %v840_v61 = vsel %vm584_vm7, %v712_v51, 0.0  ;;  %vm1862_vm8 = vcmp.ne.s32.totalorder %v393_v54, 0  ;;  %v521_v63 = vand.u32 2, %v329_v40  ;;  %v719_v53 = vld [vmem:[%s1730_s19 + $0xd0] sm:$0xff]  ;;  %v656_v57 = vld [vmem:[%s1721_s18 + $0xd8] sm:$0xff]  ;;  %s1078_s11 = scalar_lea.sflag [#allocation4], %s1706_s9 }
  0x61   : > { %1030 = vst [vmem:[%s1751_s20 + $0x88] sm:$0xff] %v966_v56  ;;  %v904_v1 = vadd.f32 %v840_v61, %v776_v58  ;;  %v777_v2 = vsel %vm1862_vm8, %v649_v52, 0.0  ;;  %v394_v3 = vand.u32 1, %v330_v55  ;;  %v522_v4 = vand.u32 2, %v330_v55  ;;  %v655_v52 = vld [vmem:[%s1721_s18 + $0xd0] sm:$0xff]  ;;  %v337_v58 = vld [vmem:[%s1713_s1 + $0xe0] sm:$0xff] }
  0x62   : > { %v967_v7 = vmul.f32 2.0, %v903_v60  ;;  %vm585_vm9 = vcmp.ne.s32.totalorder %v521_v63, 0  ;;  %v395_v8 = vand.u32 1, %v331_v59  ;;  %v523_v9 = vand.u32 2, %v331_v59  ;;  %v720_v61 = vld [vmem:[%s1730_s19 + $0xd8] sm:$0xff]  ;;  %s1468_s22 = sshra.s32 %s1096_s8, 4  ;;  %s1469_s22 = int_to_ptr.hbm [resolvable:$true] %s1468_s22 }
  0x63   : > { %v968_v12 = vmul.f32 2.0, %v904_v1  ;;  %v841_v13 = vsel %vm585_vm9, %v713_v0, 0.0  ;;  %vm458_vm10 = vcmp.ne.s32.totalorder %v394_v3, 0  ;;  %vm586_vm11 = vcmp.ne.s32.totalorder %v522_v4, 0  ;;  %s1470_s29 = scalar_lea.hbm %s1469_s22, 512  ;;  %s1474_s24 = scalar_lea.hbm %s2204_s3, 2048 }
  0x64   : > { %1031 = vst [vmem:[%s1751_s20 + $0x90] sm:$0xff] %v967_v7  ;;  %v905_v16 = vadd.f32 %v841_v13, %v777_v2  ;;  %v778_v17 = vsel %vm458_vm10, %v650_v5, 0.0  ;;  %v842_v18 = vsel %vm586_vm11, %v714_v6, 0.0  ;;  %vm459_vm12 = vcmp.ne.s32.totalorder %v395_v8, 0  ;;  %v657_v5 = vld [vmem:[%s1721_s18 + $0xe0] sm:$0xff]  ;;  %v339_v6 = vld [vmem:[%s1713_s1 + $0xf0] sm:$0xff]  ;;  %p1471_p4 = scmp.ne.s32.totalorder %s1469_s22, %s1470_s29  ;;  %p1475_p7 = scmp.lt.s32.totalorder %s1469_s22, %s2204_s3 }
  0x65   : > { %1032 = vst [vmem:[%s1751_s20 + $0x98] sm:$0xff] %v968_v12  ;;  %v906_v19 = vadd.f32 %v842_v18, %v778_v17  ;;  %vm587_vm13 = vcmp.ne.s32.totalorder %v523_v9, 0  ;;  %v779_v20 = vsel %vm459_vm12, %v651_v10, 0.0  ;;  %v396_v21 = vand.u32 1, %v332_v11  ;;  %v721_v10 = vld [vmem:[%s1730_s19 + $0xe0] sm:$0xff]  ;;  %v658_v12 = vld [vmem:[%s1721_s18 + $0xe8] sm:$0xff]  ;;  %p1476_p8 = scmp.lt.s32.totalorder %s1474_s24, %s1470_s29 }
  0x66   : > { %v969_v24 = vmul.f32 2.0, %v905_v16  ;;  %v843_v25 = vsel %vm587_vm13, %v715_v14, 0.0  ;;  %v524_v26 = vand.u32 2, %v332_v11  ;;  %v397_v28 = vand.u32 1, %v333_v15  ;;  %v722_v17 = vld [vmem:[%s1730_s19 + $0xe8] sm:$0xff]  ;;  %v659_v18 = vld [vmem:[%s1721_s18 + $0xf0] sm:$0xff]  ;;  %p1472_p5 = pnand %p1471_p4, %p1653_p9 }
  0x67   : > { %v970_v30 = vmul.f32 2.0, %v906_v19  ;;  %v907_v31 = vadd.f32 %v843_v25, %v779_v20  ;;  %vm1882_vm14 = vcmp.ne.s32.totalorder %v396_v21, 0  ;;  %v525_v33 = vand.u32 2, %v333_v15  ;;  %v340_v21 = vld [vmem:[%s1713_s1 + $0xf8] sm:$0xff]  ;;  %v341_v25 = vld [vmem:[%s1713_s1 + $0x100] sm:$0xff]  ;;  %p1477_p10 = por %p1476_p8, %p1475_p7 }
  0x68   : > { %1033 = vst [vmem:[%s1751_s20 + $0xa0] sm:$0xff] %v969_v24  ;;  %vm588_vm15 = vcmp.ne.s32.totalorder %v524_v26, 0  ;;  %v780_v36 = vsel %vm1882_vm14, %v652_v22, 0.0  ;;  %vm461_vm0 = vcmp.ne.s32.totalorder %v397_v28, 0  ;;  %v398_v37 = vand.u32 1, %v334_v23  ;;  %v348_v28 = vld [vmem:[%s1713_s1 + $0x138] sm:$0xff]  ;;  %p1473_p6 = pneg %p1472_p5 }
  0x69   : > { %1034 = vst [vmem:[%s1751_s20 + $0xa8] sm:$0xff] %v970_v30  ;;  %v971_v39 = vmul.f32 2.0, %v907_v31  ;;  %v844_v40 = vsel %vm588_vm15, %v716_v27, 0.0  ;;  %vm589_vm1 = vcmp.ne.s32.totalorder %v525_v33, 0  ;;  %v781_v41 = vsel %vm461_vm0, %v653_v29, 0.0  ;;  %v723_v30 = vld [vmem:[%s1730_s19 + $0xf0] sm:$0xff] }
  0x6a   : > { %v908_v43 = vadd.f32 %v844_v40, %v780_v36  ;;  %v845_v44 = vsel %vm589_vm1, %v717_v34, 0.0  ;;  %vm1894_vm2 = vcmp.ne.s32.totalorder %v398_v37, 0  ;;  %v526_v46 = vand.u32 2, %v334_v23  ;;  %v724_v36 = vld [vmem:[%s1730_s19 + $0xf8] sm:$0xff]  ;;  %v661_v40 = vld [vmem:[%s1721_s18 + $0x100] sm:$0xff]  ;;  %p1478_p11 = pnand %p1477_p10, %p1473_p6 }
  0x6b   : > { %1035 = vst [vmem:[%s1751_s20 + $0xb0] sm:$0xff] %v971_v39  ;;  %v909_v48 = vadd.f32 %v845_v44, %v781_v41  ;;  %v782_v49 = vsel %vm1894_vm2, %v654_v35, 0.0  ;;  %v399_v50 = vand.u32 1, %v335_v38  ;;  %v527_v51 = vand.u32 2, %v335_v38  ;;  %v660_v35 = vld [vmem:[%s1721_s18 + $0xf8] sm:$0xff]  ;;  %v342_v41 = vld [vmem:[%s1713_s1 + $0x108] sm:$0xff] }
  0x6c   : > { %v972_v54 = vmul.f32 2.0, %v908_v43  ;;  %vm590_vm3 = vcmp.ne.s32.totalorder %v526_v46, 0  ;;  %v400_v55 = vand.u32 1, %v336_v42  ;;  %v528_v56 = vand.u32 2, %v336_v42  ;;  %v725_v44 = vld [vmem:[%s1730_s19 + $0x100] sm:$0xff] }
  0x6d   : > { %v973_v59 = vmul.f32 2.0, %v909_v48  ;;  %v846_v60 = vsel %vm590_vm3, %v718_v47, 0.0  ;;  %vm463_vm4 = vcmp.ne.s32.totalorder %v399_v50, 0  ;;  %vm591_vm5 = vcmp.ne.s32.totalorder %v527_v51, 0 }
  0x6e   : > { %1036 = vst [vmem:[%s1751_s20 + $0xb8] sm:$0xff] %v972_v54  ;;  %v910_v63 = vadd.f32 %v846_v60, %v782_v49  ;;  %v783_v0 = vsel %vm463_vm4, %v655_v52, 0.0  ;;  %v847_v1 = vsel %vm591_vm5, %v719_v53, 0.0  ;;  %vm464_vm6 = vcmp.ne.s32.totalorder %v400_v55, 0  ;;  %v662_v52 = vld [vmem:[%s1721_s18 + $0x108] sm:$0xff]  ;;  %v344_v53 = vld [vmem:[%s1713_s1 + $0x118] sm:$0xff] }
  0x6f   : > { %1037 = vst [vmem:[%s1751_s20 + $0xc0] sm:$0xff] %v973_v59  ;;  %v911_v2 = vadd.f32 %v847_v1, %v783_v0  ;;  %vm592_vm7 = vcmp.ne.s32.totalorder %v528_v56, 0  ;;  %v784_v3 = vsel %vm464_vm6, %v656_v57, 0.0  ;;  %v401_v4 = vand.u32 1, %v337_v58  ;;  %v726_v57 = vld [vmem:[%s1730_s19 + $0x108] sm:$0xff]  ;;  %v663_v59 = vld [vmem:[%s1721_s18 + $0x110] sm:$0xff] }
  0x70   : > { %v974_v7 = vmul.f32 2.0, %v910_v63  ;;  %v848_v8 = vsel %vm592_vm7, %v720_v61, 0.0  ;;  %v529_v9 = vand.u32 2, %v337_v58  ;;  %v402_v11 = vand.u32 1, %v338_v62  ;;  %v727_v0 = vld [vmem:[%s1730_s19 + $0x110] sm:$0xff]  ;;  %v664_v1 = vld [vmem:[%s1721_s18 + $0x118] sm:$0xff] }
  0x71   : > { %v975_v13 = vmul.f32 2.0, %v911_v2  ;;  %v912_v14 = vadd.f32 %v848_v8, %v784_v3  ;;  %vm1914_vm8 = vcmp.ne.s32.totalorder %v401_v4, 0  ;;  %v530_v16 = vand.u32 2, %v338_v62  ;;  %v345_v4 = vld [vmem:[%s1713_s1 + $0x120] sm:$0xff]  ;;  %v346_v8 = vld [vmem:[%s1713_s1 + $0x128] sm:$0xff] }
  0x72   : > { %1038 = vst [vmem:[%s1751_s20 + $0xc8] sm:$0xff] %v974_v7  ;;  %vm593_vm9 = vcmp.ne.s32.totalorder %v529_v9, 0  ;;  %v785_v19 = vsel %vm1914_vm8, %v657_v5, 0.0  ;;  %vm466_vm10 = vcmp.ne.s32.totalorder %v402_v11, 0  ;;  %v403_v20 = vand.u32 1, %v339_v6  ;;  %v353_v11 = vld [vmem:[%s1713_s1 + $0x160] sm:$0xff] }
  0x73   : > { %1039 = vst [vmem:[%s1751_s20 + $0xd0] sm:$0xff] %v975_v13  ;;  %v976_v22 = vmul.f32 2.0, %v912_v14  ;;  %v849_v23 = vsel %vm593_vm9, %v721_v10, 0.0  ;;  %vm594_vm11 = vcmp.ne.s32.totalorder %v530_v16, 0  ;;  %v786_v24 = vsel %vm466_vm10, %v658_v12, 0.0  ;;  %v728_v13 = vld [vmem:[%s1730_s19 + $0x118] sm:$0xff] }
  0x74   : > { %v913_v26 = vadd.f32 %v849_v23, %v785_v19  ;;  %v850_v27 = vsel %vm594_vm11, %v722_v17, 0.0  ;;  %vm1926_vm12 = vcmp.ne.s32.totalorder %v403_v20, 0  ;;  %v531_v29 = vand.u32 2, %v339_v6  ;;  %v729_v19 = vld [vmem:[%s1730_s19 + $0x120] sm:$0xff]  ;;  %v666_v23 = vld [vmem:[%s1721_s18 + $0x128] sm:$0xff] }
  0x75   : > { %1040 = vst [vmem:[%s1751_s20 + $0xd8] sm:$0xff] %v976_v22  ;;  %v914_v31 = vadd.f32 %v850_v27, %v786_v24  ;;  %v787_v32 = vsel %vm1926_vm12, %v659_v18, 0.0  ;;  %v404_v33 = vand.u32 1, %v340_v21  ;;  %v532_v34 = vand.u32 2, %v340_v21  ;;  %v665_v18 = vld [vmem:[%s1721_s18 + $0x120] sm:$0xff]  ;;  %v347_v24 = vld [vmem:[%s1713_s1 + $0x130] sm:$0xff] }
  0x76   : > { %v977_v37 = vmul.f32 2.0, %v913_v26  ;;  %vm595_vm13 = vcmp.ne.s32.totalorder %v531_v29, 0  ;;  %v405_v38 = vand.u32 1, %v341_v25  ;;  %v533_v39 = vand.u32 2, %v341_v25  ;;  %v730_v27 = vld [vmem:[%s1730_s19 + $0x128] sm:$0xff] }
  0x77   : > { %v978_v42 = vmul.f32 2.0, %v914_v31  ;;  %v851_v43 = vsel %vm595_vm13, %v723_v30, 0.0  ;;  %vm468_vm14 = vcmp.ne.s32.totalorder %v404_v33, 0  ;;  %vm596_vm15 = vcmp.ne.s32.totalorder %v532_v34, 0 }
  0x78   : > { %1041 = vst [vmem:[%s1751_s20 + $0xe0] sm:$0xff] %v977_v37  ;;  %v915_v46 = vadd.f32 %v851_v43, %v787_v32  ;;  %v788_v47 = vsel %vm468_vm14, %v660_v35, 0.0  ;;  %v852_v48 = vsel %vm596_vm15, %v724_v36, 0.0  ;;  %vm469_vm0 = vcmp.ne.s32.totalorder %v405_v38, 0  ;;  %v667_v35 = vld [vmem:[%s1721_s18 + $0x130] sm:$0xff]  ;;  %v349_v36 = vld [vmem:[%s1713_s1 + $0x140] sm:$0xff] }
  0x79   : > { %1042 = vst [vmem:[%s1751_s20 + $0xe8] sm:$0xff] %v978_v42  ;;  %v916_v49 = vadd.f32 %v852_v48, %v788_v47  ;;  %vm597_vm1 = vcmp.ne.s32.totalorder %v533_v39, 0  ;;  %v789_v50 = vsel %vm469_vm0, %v661_v40, 0.0  ;;  %v406_v51 = vand.u32 1, %v342_v41  ;;  %v731_v40 = vld [vmem:[%s1730_s19 + $0x130] sm:$0xff]  ;;  %v668_v42 = vld [vmem:[%s1721_s18 + $0x138] sm:$0xff] }
  0x7a   : > { %v979_v54 = vmul.f32 2.0, %v915_v46  ;;  %v853_v55 = vsel %vm597_vm1, %v725_v44, 0.0  ;;  %v534_v56 = vand.u32 2, %v342_v41  ;;  %v407_v58 = vand.u32 1, %v343_v45  ;;  %v732_v47 = vld [vmem:[%s1730_s19 + $0x138] sm:$0xff]  ;;  %v669_v48 = vld [vmem:[%s1721_s18 + $0x140] sm:$0xff] }
  0x7b   : > { %v980_v60 = vmul.f32 2.0, %v916_v49  ;;  %v917_v61 = vadd.f32 %v853_v55, %v789_v50  ;;  %vm1946_vm2 = vcmp.ne.s32.totalorder %v406_v51, 0  ;;  %v535_v63 = vand.u32 2, %v343_v45  ;;  %v350_v51 = vld [vmem:[%s1713_s1 + $0x148] sm:$0xff]  ;;  %v351_v55 = vld [vmem:[%s1713_s1 + $0x150] sm:$0xff] }
  0x7c   : > { %1043 = vst [vmem:[%s1751_s20 + $0xf0] sm:$0xff] %v979_v54  ;;  %vm598_vm3 = vcmp.ne.s32.totalorder %v534_v56, 0  ;;  %v790_v2 = vsel %vm1946_vm2, %v662_v52, 0.0  ;;  %vm471_vm4 = vcmp.ne.s32.totalorder %v407_v58, 0  ;;  %v408_v3 = vand.u32 1, %v344_v53  ;;  %v358_v58 = vld [vmem:[%s1713_s1 + $0x188] sm:$0xff] }
  0x7d   : > { %1044 = vst [vmem:[%s1751_s20 + $0xf8] sm:$0xff] %v980_v60  ;;  %v981_v5 = vmul.f32 2.0, %v917_v61  ;;  %v854_v6 = vsel %vm598_vm3, %v726_v57, 0.0  ;;  %vm599_vm5 = vcmp.ne.s32.totalorder %v535_v63, 0  ;;  %v791_v7 = vsel %vm471_vm4, %v663_v59, 0.0  ;;  %v733_v60 = vld [vmem:[%s1730_s19 + $0x140] sm:$0xff] }
  0x7e   : > { %v918_v9 = vadd.f32 %v854_v6, %v790_v2  ;;  %v855_v10 = vsel %vm599_vm5, %v727_v0, 0.0  ;;  %vm1958_vm6 = vcmp.ne.s32.totalorder %v408_v3, 0  ;;  %v536_v12 = vand.u32 2, %v344_v53  ;;  %v734_v2 = vld [vmem:[%s1730_s19 + $0x148] sm:$0xff]  ;;  %v671_v6 = vld [vmem:[%s1721_s18 + $0x150] sm:$0xff] }
  0x7f   : > { %1045 = vst [vmem:[%s1751_s20 + $0x100] sm:$0xff] %v981_v5  ;;  %v919_v14 = vadd.f32 %v855_v10, %v791_v7  ;;  %v792_v15 = vsel %vm1958_vm6, %v664_v1, 0.0  ;;  %v409_v16 = vand.u32 1, %v345_v4  ;;  %v537_v17 = vand.u32 2, %v345_v4  ;;  %v670_v1 = vld [vmem:[%s1721_s18 + $0x148] sm:$0xff]  ;;  %v352_v7 = vld [vmem:[%s1713_s1 + $0x158] sm:$0xff] }
  0x80   : > { %v982_v20 = vmul.f32 2.0, %v918_v9  ;;  %vm600_vm7 = vcmp.ne.s32.totalorder %v536_v12, 0  ;;  %v410_v21 = vand.u32 1, %v346_v8  ;;  %v538_v22 = vand.u32 2, %v346_v8  ;;  %v735_v10 = vld [vmem:[%s1730_s19 + $0x150] sm:$0xff] }
  0x81   : > { %v983_v25 = vmul.f32 2.0, %v919_v14  ;;  %v856_v26 = vsel %vm600_vm7, %v728_v13, 0.0  ;;  %vm473_vm8 = vcmp.ne.s32.totalorder %v409_v16, 0  ;;  %vm601_vm9 = vcmp.ne.s32.totalorder %v537_v17, 0 }
  0x82   : > { %1046 = vst [vmem:[%s1751_s20 + $0x108] sm:$0xff] %v982_v20  ;;  %v920_v29 = vadd.f32 %v856_v26, %v792_v15  ;;  %v793_v30 = vsel %vm473_vm8, %v665_v18, 0.0  ;;  %v857_v31 = vsel %vm601_vm9, %v729_v19, 0.0  ;;  %vm474_vm10 = vcmp.ne.s32.totalorder %v410_v21, 0  ;;  %v672_v18 = vld [vmem:[%s1721_s18 + $0x158] sm:$0xff]  ;;  %v354_v19 = vld [vmem:[%s1713_s1 + $0x168] sm:$0xff] }
  0x83   : > { %1047 = vst [vmem:[%s1751_s20 + $0x110] sm:$0xff] %v983_v25  ;;  %v921_v32 = vadd.f32 %v857_v31, %v793_v30  ;;  %vm602_vm11 = vcmp.ne.s32.totalorder %v538_v22, 0  ;;  %v794_v33 = vsel %vm474_vm10, %v666_v23, 0.0  ;;  %v411_v34 = vand.u32 1, %v347_v24  ;;  %v736_v23 = vld [vmem:[%s1730_s19 + $0x158] sm:$0xff]  ;;  %v673_v25 = vld [vmem:[%s1721_s18 + $0x160] sm:$0xff] }
  0x84   : > { %v984_v37 = vmul.f32 2.0, %v920_v29  ;;  %v858_v38 = vsel %vm602_vm11, %v730_v27, 0.0  ;;  %v539_v39 = vand.u32 2, %v347_v24  ;;  %v412_v41 = vand.u32 1, %v348_v28  ;;  %v737_v30 = vld [vmem:[%s1730_s19 + $0x160] sm:$0xff]  ;;  %v674_v31 = vld [vmem:[%s1721_s18 + $0x168] sm:$0xff] }
  0x85   : > { %v985_v43 = vmul.f32 2.0, %v921_v32  ;;  %v922_v44 = vadd.f32 %v858_v38, %v794_v33  ;;  %vm1978_vm12 = vcmp.ne.s32.totalorder %v411_v34, 0  ;;  %v540_v46 = vand.u32 2, %v348_v28  ;;  %v355_v34 = vld [vmem:[%s1713_s1 + $0x170] sm:$0xff]  ;;  %v356_v38 = vld [vmem:[%s1713_s1 + $0x178] sm:$0xff] }
  0x86   : > { %1048 = vst [vmem:[%s1751_s20 + $0x118] sm:$0xff] %v984_v37  ;;  %vm603_vm13 = vcmp.ne.s32.totalorder %v539_v39, 0  ;;  %v795_v49 = vsel %vm1978_vm12, %v667_v35, 0.0  ;;  %vm476_vm14 = vcmp.ne.s32.totalorder %v412_v41, 0  ;;  %v413_v50 = vand.u32 1, %v349_v36  ;;  %v363_v41 = vld [vmem:[%s1713_s1 + $0x1b0] sm:$0xff] }
  0x87   : > { %1049 = vst [vmem:[%s1751_s20 + $0x120] sm:$0xff] %v985_v43  ;;  %v986_v52 = vmul.f32 2.0, %v922_v44  ;;  %v859_v53 = vsel %vm603_vm13, %v731_v40, 0.0  ;;  %vm604_vm15 = vcmp.ne.s32.totalorder %v540_v46, 0  ;;  %v796_v54 = vsel %vm476_vm14, %v668_v42, 0.0  ;;  %v738_v43 = vld [vmem:[%s1730_s19 + $0x168] sm:$0xff] }
  0x88   : > { %v923_v56 = vadd.f32 %v859_v53, %v795_v49  ;;  %v860_v57 = vsel %vm604_vm15, %v732_v47, 0.0  ;;  %vm1990_vm0 = vcmp.ne.s32.totalorder %v413_v50, 0  ;;  %v541_v59 = vand.u32 2, %v349_v36  ;;  %v739_v49 = vld [vmem:[%s1730_s19 + $0x170] sm:$0xff]  ;;  %v676_v53 = vld [vmem:[%s1721_s18 + $0x178] sm:$0xff] }
  0x89   : > { %1050 = vst [vmem:[%s1751_s20 + $0x128] sm:$0xff] %v986_v52  ;;  %v924_v61 = vadd.f32 %v860_v57, %v796_v54  ;;  %v797_v62 = vsel %vm1990_vm0, %v669_v48, 0.0  ;;  %v414_v63 = vand.u32 1, %v350_v51  ;;  %v542_v0 = vand.u32 2, %v350_v51  ;;  %v675_v48 = vld [vmem:[%s1721_s18 + $0x170] sm:$0xff]  ;;  %v357_v54 = vld [vmem:[%s1713_s1 + $0x180] sm:$0xff] }
  0x8a   : > { %v987_v3 = vmul.f32 2.0, %v923_v56  ;;  %vm605_vm1 = vcmp.ne.s32.totalorder %v541_v59, 0  ;;  %v415_v4 = vand.u32 1, %v351_v55  ;;  %v543_v5 = vand.u32 2, %v351_v55  ;;  %v740_v57 = vld [vmem:[%s1730_s19 + $0x178] sm:$0xff] }
  0x8b   : > { %v988_v8 = vmul.f32 2.0, %v924_v61  ;;  %v861_v9 = vsel %vm605_vm1, %v733_v60, 0.0  ;;  %vm478_vm2 = vcmp.ne.s32.totalorder %v414_v63, 0  ;;  %vm606_vm3 = vcmp.ne.s32.totalorder %v542_v0, 0 }
  0x8c   : > { %1051 = vst [vmem:[%s1751_s20 + $0x130] sm:$0xff] %v987_v3  ;;  %v925_v12 = vadd.f32 %v861_v9, %v797_v62  ;;  %v798_v13 = vsel %vm478_vm2, %v670_v1, 0.0  ;;  %v862_v14 = vsel %vm606_vm3, %v734_v2, 0.0  ;;  %vm479_vm4 = vcmp.ne.s32.totalorder %v415_v4, 0  ;;  %v677_v1 = vld [vmem:[%s1721_s18 + $0x180] sm:$0xff]  ;;  %v359_v2 = vld [vmem:[%s1713_s1 + $0x190] sm:$0xff] }
  0x8d   : > { %1052 = vst [vmem:[%s1751_s20 + $0x138] sm:$0xff] %v988_v8  ;;  %v926_v15 = vadd.f32 %v862_v14, %v798_v13  ;;  %vm607_vm5 = vcmp.ne.s32.totalorder %v543_v5, 0  ;;  %v799_v16 = vsel %vm479_vm4, %v671_v6, 0.0  ;;  %v416_v17 = vand.u32 1, %v352_v7  ;;  %v741_v6 = vld [vmem:[%s1730_s19 + $0x180] sm:$0xff]  ;;  %v678_v8 = vld [vmem:[%s1721_s18 + $0x188] sm:$0xff] }
  0x8e   : > { %v989_v20 = vmul.f32 2.0, %v925_v12  ;;  %v863_v21 = vsel %vm607_vm5, %v735_v10, 0.0  ;;  %v544_v22 = vand.u32 2, %v352_v7  ;;  %v417_v24 = vand.u32 1, %v353_v11  ;;  %v742_v13 = vld [vmem:[%s1730_s19 + $0x188] sm:$0xff]  ;;  %v679_v14 = vld [vmem:[%s1721_s18 + $0x190] sm:$0xff] }
  0x8f   : > { %v990_v26 = vmul.f32 2.0, %v926_v15  ;;  %v927_v27 = vadd.f32 %v863_v21, %v799_v16  ;;  %vm2010_vm6 = vcmp.ne.s32.totalorder %v416_v17, 0  ;;  %v545_v29 = vand.u32 2, %v353_v11  ;;  %v360_v17 = vld [vmem:[%s1713_s1 + $0x198] sm:$0xff]  ;;  %v361_v21 = vld [vmem:[%s1713_s1 + $0x1a0] sm:$0xff] }
  0x90   : > { %1053 = vst [vmem:[%s1751_s20 + $0x140] sm:$0xff] %v989_v20  ;;  %vm608_vm7 = vcmp.ne.s32.totalorder %v544_v22, 0  ;;  %v800_v32 = vsel %vm2010_vm6, %v672_v18, 0.0  ;;  %vm481_vm8 = vcmp.ne.s32.totalorder %v417_v24, 0  ;;  %v418_v33 = vand.u32 1, %v354_v19  ;;  %v368_v24 = vld [vmem:[%s1713_s1 + $0x1d8] sm:$0xff] }
  0x91   : > { %1054 = vst [vmem:[%s1751_s20 + $0x148] sm:$0xff] %v990_v26  ;;  %v991_v35 = vmul.f32 2.0, %v927_v27  ;;  %v864_v36 = vsel %vm608_vm7, %v736_v23, 0.0  ;;  %vm609_vm9 = vcmp.ne.s32.totalorder %v545_v29, 0  ;;  %v801_v37 = vsel %vm481_vm8, %v673_v25, 0.0  ;;  %v743_v26 = vld [vmem:[%s1730_s19 + $0x190] sm:$0xff] }
  0x92   : > { %v928_v39 = vadd.f32 %v864_v36, %v800_v32  ;;  %v865_v40 = vsel %vm609_vm9, %v737_v30, 0.0  ;;  %vm2022_vm10 = vcmp.ne.s32.totalorder %v418_v33, 0  ;;  %v546_v42 = vand.u32 2, %v354_v19  ;;  %v744_v32 = vld [vmem:[%s1730_s19 + $0x198] sm:$0xff]  ;;  %v681_v36 = vld [vmem:[%s1721_s18 + $0x1a0] sm:$0xff] }
  0x93   : > { %1055 = vst [vmem:[%s1751_s20 + $0x150] sm:$0xff] %v991_v35  ;;  %v929_v44 = vadd.f32 %v865_v40, %v801_v37  ;;  %v802_v45 = vsel %vm2022_vm10, %v674_v31, 0.0  ;;  %v419_v46 = vand.u32 1, %v355_v34  ;;  %v547_v47 = vand.u32 2, %v355_v34  ;;  %v680_v31 = vld [vmem:[%s1721_s18 + $0x198] sm:$0xff]  ;;  %v362_v37 = vld [vmem:[%s1713_s1 + $0x1a8] sm:$0xff] }
  0x94   : > { %v992_v50 = vmul.f32 2.0, %v928_v39  ;;  %vm610_vm11 = vcmp.ne.s32.totalorder %v546_v42, 0  ;;  %v420_v51 = vand.u32 1, %v356_v38  ;;  %v548_v52 = vand.u32 2, %v356_v38  ;;  %v745_v40 = vld [vmem:[%s1730_s19 + $0x1a0] sm:$0xff] }
  0x95   : > { %v993_v55 = vmul.f32 2.0, %v929_v44  ;;  %v866_v56 = vsel %vm610_vm11, %v738_v43, 0.0  ;;  %vm483_vm12 = vcmp.ne.s32.totalorder %v419_v46, 0  ;;  %vm611_vm13 = vcmp.ne.s32.totalorder %v547_v47, 0 }
  0x96   : > { %1056 = vst [vmem:[%s1751_s20 + $0x158] sm:$0xff] %v992_v50  ;;  %v930_v59 = vadd.f32 %v866_v56, %v802_v45  ;;  %v803_v60 = vsel %vm483_vm12, %v675_v48, 0.0  ;;  %v867_v61 = vsel %vm611_vm13, %v739_v49, 0.0  ;;  %vm484_vm14 = vcmp.ne.s32.totalorder %v420_v51, 0  ;;  %v682_v48 = vld [vmem:[%s1721_s18 + $0x1a8] sm:$0xff]  ;;  %v364_v49 = vld [vmem:[%s1713_s1 + $0x1b8] sm:$0xff] }
  0x97   : > { %1057 = vst [vmem:[%s1751_s20 + $0x160] sm:$0xff] %v993_v55  ;;  %v931_v62 = vadd.f32 %v867_v61, %v803_v60  ;;  %vm612_vm15 = vcmp.ne.s32.totalorder %v548_v52, 0  ;;  %v804_v63 = vsel %vm484_vm14, %v676_v53, 0.0  ;;  %v421_v0 = vand.u32 1, %v357_v54  ;;  %v746_v53 = vld [vmem:[%s1730_s19 + $0x1a8] sm:$0xff]  ;;  %v683_v55 = vld [vmem:[%s1721_s18 + $0x1b0] sm:$0xff] }
  0x98   : > { %v994_v3 = vmul.f32 2.0, %v930_v59  ;;  %v868_v4 = vsel %vm612_vm15, %v740_v57, 0.0  ;;  %v549_v5 = vand.u32 2, %v357_v54  ;;  %v422_v7 = vand.u32 1, %v358_v58  ;;  %v747_v60 = vld [vmem:[%s1730_s19 + $0x1b0] sm:$0xff]  ;;  %v365_v61 = vld [vmem:[%s1713_s1 + $0x1c0] sm:$0xff] }
  0x99   : > { %v995_v9 = vmul.f32 2.0, %v931_v62  ;;  %v932_v10 = vadd.f32 %v868_v4, %v804_v63  ;;  %vm2042_vm0 = vcmp.ne.s32.totalorder %v421_v0, 0  ;;  %v550_v12 = vand.u32 2, %v358_v58  ;;  %v684_v0 = vld [vmem:[%s1721_s18 + $0x1b8] sm:$0xff]  ;;  %v366_v4 = vld [vmem:[%s1713_s1 + $0x1c8] sm:$0xff]  ;;  %v753_v58 = vld [vmem:[%s1730_s19 + $0x1e0] sm:$0xff] }
  0x9a   : > { %1058 = vst [vmem:[%s1751_s20 + $0x168] sm:$0xff] %v994_v3  ;;  %vm613_vm1 = vcmp.ne.s32.totalorder %v549_v5, 0  ;;  %v805_v15 = vsel %vm2042_vm0, %v677_v1, 0.0  ;;  %vm486_vm2 = vcmp.ne.s32.totalorder %v422_v7, 0  ;;  %v423_v16 = vand.u32 1, %v359_v2 }
  0x9b   : > { %1059 = vst [vmem:[%s1751_s20 + $0x170] sm:$0xff] %v995_v9  ;;  %v996_v18 = vmul.f32 2.0, %v932_v10  ;;  %v869_v19 = vsel %vm613_vm1, %v741_v6, 0.0  ;;  %vm614_vm3 = vcmp.ne.s32.totalorder %v550_v12, 0  ;;  %v806_v20 = vsel %vm486_vm2, %v678_v8, 0.0  ;;  %v748_v9 = vld [vmem:[%s1730_s19 + $0x1b8] sm:$0xff] }
  0x9c   : > { %v933_v22 = vadd.f32 %v869_v19, %v805_v15  ;;  %v870_v23 = vsel %vm614_vm3, %v742_v13, 0.0  ;;  %vm2054_vm4 = vcmp.ne.s32.totalorder %v423_v16, 0  ;;  %v551_v25 = vand.u32 2, %v359_v2  ;;  %v749_v15 = vld [vmem:[%s1730_s19 + $0x1c0] sm:$0xff]  ;;  %v686_v19 = vld [vmem:[%s1721_s18 + $0x1c8] sm:$0xff] }
  0x9d   : > { %1060 = vst [vmem:[%s1751_s20 + $0x178] sm:$0xff] %v996_v18  ;;  %v934_v27 = vadd.f32 %v870_v23, %v806_v20  ;;  %v807_v28 = vsel %vm2054_vm4, %v679_v14, 0.0  ;;  %v424_v29 = vand.u32 1, %v360_v17  ;;  %v552_v30 = vand.u32 2, %v360_v17  ;;  %v685_v14 = vld [vmem:[%s1721_s18 + $0x1c0] sm:$0xff]  ;;  %v367_v20 = vld [vmem:[%s1713_s1 + $0x1d0] sm:$0xff] }
  0x9e   : > { %v997_v33 = vmul.f32 2.0, %v933_v22  ;;  %vm615_vm5 = vcmp.ne.s32.totalorder %v551_v25, 0  ;;  %v425_v34 = vand.u32 1, %v361_v21  ;;  %v553_v35 = vand.u32 2, %v361_v21  ;;  %v750_v23 = vld [vmem:[%s1730_s19 + $0x1c8] sm:$0xff] }
  0x9f   : > { %v998_v38 = vmul.f32 2.0, %v934_v27  ;;  %v871_v39 = vsel %vm615_vm5, %v743_v26, 0.0  ;;  %vm488_vm6 = vcmp.ne.s32.totalorder %v424_v29, 0  ;;  %vm616_vm7 = vcmp.ne.s32.totalorder %v552_v30, 0 }
  0xa0   : > { %1061 = vst [vmem:[%s1751_s20 + $0x180] sm:$0xff] %v997_v33  ;;  %v935_v42 = vadd.f32 %v871_v39, %v807_v28  ;;  %v808_v43 = vsel %vm488_vm6, %v680_v31, 0.0  ;;  %v872_v44 = vsel %vm616_vm7, %v744_v32, 0.0  ;;  %vm489_vm8 = vcmp.ne.s32.totalorder %v425_v34, 0  ;;  %v687_v32 = vld [vmem:[%s1721_s18 + $0x1d0] sm:$0xff]  ;;  %v369_v33 = vld [vmem:[%s1713_s1 + $0x1e0] sm:$0xff] }
  0xa1   : > { %1062 = vst [vmem:[%s1751_s20 + $0x188] sm:$0xff] %v998_v38  ;;  %v936_v45 = vadd.f32 %v872_v44, %v808_v43  ;;  %vm617_vm9 = vcmp.ne.s32.totalorder %v553_v35, 0  ;;  %v809_v46 = vsel %vm489_vm8, %v681_v36, 0.0  ;;  %v426_v47 = vand.u32 1, %v362_v37  ;;  %v688_v39 = vld [vmem:[%s1721_s18 + $0x1d8] sm:$0xff] }
  0xa2   : > { %v999_v50 = vmul.f32 2.0, %v935_v42  ;;  %v873_v51 = vsel %vm617_vm9, %v745_v40, 0.0  ;;  %v554_v52 = vand.u32 2, %v362_v37  ;;  %v427_v54 = vand.u32 1, %v363_v41  ;;  %v751_v37 = vld [vmem:[%s1730_s19 + $0x1d0] sm:$0xff]  ;;  %v752_v44 = vld [vmem:[%s1730_s19 + $0x1d8] sm:$0xff] }
  0xa3   : > { %v1000_v56 = vmul.f32 2.0, %v936_v45  ;;  %v937_v57 = vadd.f32 %v873_v51, %v809_v46  ;;  %vm2074_vm10 = vcmp.ne.s32.totalorder %v426_v47, 0  ;;  %v555_v59 = vand.u32 2, %v363_v41  ;;  %v370_v45 = vld [vmem:[%s1713_s1 + $0x1e8] sm:$0xff] }
  0xa4   : > { %1063 = vst [vmem:[%s1751_s20 + $0x190] sm:$0xff] %v999_v50  ;;  %vm618_vm11 = vcmp.ne.s32.totalorder %v554_v52, 0  ;;  %v810_v62 = vsel %vm2074_vm10, %v682_v48, 0.0  ;;  %vm491_vm12 = vcmp.ne.s32.totalorder %v427_v54, 0  ;;  %v428_v63 = vand.u32 1, %v364_v49 }
  0xa5   : > { %1064 = vst [vmem:[%s1751_s20 + $0x198] sm:$0xff] %v1000_v56  ;;  %v1001_v1 = vmul.f32 2.0, %v937_v57  ;;  %v874_v2 = vsel %vm618_vm11, %v746_v53, 0.0  ;;  %vm619_vm13 = vcmp.ne.s32.totalorder %v555_v59, 0  ;;  %v811_v3 = vsel %vm491_vm12, %v683_v55, 0.0  ;;  %v371_v53 = vld [vmem:[%s1713_s1 + $0x1f0] sm:$0xff] }
  0xa6   : > { %v938_v5 = vadd.f32 %v874_v2, %v810_v62  ;;  %v875_v6 = vsel %vm619_vm13, %v747_v60, 0.0  ;;  %vm2086_vm14 = vcmp.ne.s32.totalorder %v428_v63, 0  ;;  %v556_v8 = vand.u32 2, %v364_v49  ;;  %v689_v49 = vld [vmem:[%s1721_s18 + $0x1e0] sm:$0xff]  ;;  %v690_v63 = vld [vmem:[%s1721_s18 + $0x1e8] sm:$0xff] }
  0xa7   : > { %1065 = vst [vmem:[%s1751_s20 + $0x1a0] sm:$0xff] %v1001_v1  ;;  %v939_v10 = vadd.f32 %v875_v6, %v811_v3  ;;  %v812_v11 = vsel %vm2086_vm14, %v684_v0, 0.0  ;;  %v429_v12 = vand.u32 1, %v365_v61  ;;  %v557_v13 = vand.u32 2, %v365_v61  ;;  %v754_v0 = vld [vmem:[%s1730_s19 + $0x1e8] sm:$0xff] }
  0xa8   : > { %v1002_v16 = vmul.f32 2.0, %v938_v5  ;;  %vm620_vm15 = vcmp.ne.s32.totalorder %v556_v8, 0  ;;  %v430_v17 = vand.u32 1, %v366_v4  ;;  %v558_v18 = vand.u32 2, %v366_v4  ;;  %v691_v4 = vld [vmem:[%s1721_s18 + $0x1f0] sm:$0xff]  ;;  %v372_v5 = vld [vmem:[%s1713_s1 + $0x1f8] sm:$0xff] }
  0xa9   : > { %v1003_v21 = vmul.f32 2.0, %v939_v10  ;;  %v876_v22 = vsel %vm620_vm15, %v748_v9, 0.0  ;;  %vm493_vm0 = vcmp.ne.s32.totalorder %v429_v12, 0  ;;  %vm621_vm1 = vcmp.ne.s32.totalorder %v557_v13, 0  ;;  %v755_v8 = vld [vmem:[%s1730_s19 + $0x1f0] sm:$0xff] }
  0xaa   : > { %1066 = vst [vmem:[%s1751_s20 + $0x1a8] sm:$0xff] %v1002_v16  ;;  %v940_v25 = vadd.f32 %v876_v22, %v812_v11  ;;  %v813_v26 = vsel %vm493_vm0, %v685_v14, 0.0  ;;  %v877_v27 = vsel %vm621_vm1, %v749_v15, 0.0  ;;  %vm2101_vm2 = vcmp.ne.s32.totalorder %v430_v17, 0  ;;  %v692_v15 = vld [vmem:[%s1721_s18 + $0x1f8] sm:$0xff] }
  0xab   : > { %1067 = vst [vmem:[%s1751_s20 + $0x1b0] sm:$0xff] %v1003_v21  ;;  %v941_v29 = vadd.f32 %v877_v27, %v813_v26  ;;  %vm622_vm3 = vcmp.ne.s32.totalorder %v558_v18, 0  ;;  %v814_v30 = vsel %vm2101_vm2, %v686_v19, 0.0  ;;  %v431_v31 = vand.u32 1, %v367_v20  ;;  %v756_v19 = vld [vmem:[%s1730_s19 + $0x1f8] sm:$0xff] }
  0xac   : > { %v1004_v34 = vmul.f32 2.0, %v940_v25  ;;  %v878_v35 = vsel %vm622_vm3, %v750_v23, 0.0  ;;  %v559_v36 = vand.u32 2, %v367_v20  ;;  %v432_v38 = vand.u32 1, %v368_v24 }
  0xad   : > { %v1005_v40 = vmul.f32 2.0, %v941_v29  ;;  %v942_v41 = vadd.f32 %v878_v35, %v814_v30  ;;  %vm2114_vm4 = vcmp.ne.s32.totalorder %v431_v31, 0  ;;  %v560_v43 = vand.u32 2, %v368_v24 }
  0xae   : > { %1068 = vst [vmem:[%s1751_s20 + $0x1b8] sm:$0xff] %v1004_v34  ;;  %vm623_vm5 = vcmp.ne.s32.totalorder %v559_v36, 0  ;;  %v815_v46 = vsel %vm2114_vm4, %v687_v32, 0.0  ;;  %vm2125_vm6 = vcmp.ne.s32.totalorder %v432_v38, 0  ;;  %v433_v48 = vand.u32 1, %v369_v33 }
  0xaf   : > { %1069 = vst [vmem:[%s1751_s20 + $0x1c0] sm:$0xff] %v1005_v40  ;;  %v1006_v50 = vmul.f32 2.0, %v942_v41  ;;  %v879_v51 = vsel %vm623_vm5, %v751_v37, 0.0  ;;  %vm624_vm7 = vcmp.ne.s32.totalorder %v560_v43, 0  ;;  %v816_v52 = vsel %vm2125_vm6, %v688_v39, 0.0 }
  0xb0   : > { %v943_v54 = vadd.f32 %v879_v51, %v815_v46  ;;  %v880_v55 = vsel %vm624_vm7, %v752_v44, 0.0  ;;  %vm2134_vm8 = vcmp.ne.s32.totalorder %v433_v48, 0  ;;  %v561_v57 = vand.u32 2, %v369_v33 }
  0xb1   : > { %1070 = vst [vmem:[%s1751_s20 + $0x1c8] sm:$0xff] %v1006_v50  ;;  %v944_v59 = vadd.f32 %v880_v55, %v816_v52  ;;  %v817_v60 = vsel %vm2134_vm8, %v689_v49, 0.0  ;;  %v434_v61 = vand.u32 1, %v370_v45  ;;  %v562_v62 = vand.u32 2, %v370_v45 }
  0xb2   : > { %v1007_v1 = vmul.f32 2.0, %v943_v54  ;;  %vm625_vm9 = vcmp.ne.s32.totalorder %v561_v57, 0  ;;  %v435_v2 = vand.u32 1, %v371_v53  ;;  %v563_v3 = vand.u32 2, %v371_v53 }
  0xb3   : > { %v1008_v6 = vmul.f32 2.0, %v944_v59  ;;  %v881_v7 = vsel %vm625_vm9, %v753_v58, 0.0  ;;  %vm498_vm10 = vcmp.ne.s32.totalorder %v434_v61, 0  ;;  %vm626_vm11 = vcmp.ne.s32.totalorder %v562_v62, 0 }
  0xb4   : > { %1071 = vst [vmem:[%s1751_s20 + $0x1d0] sm:$0xff] %v1007_v1  ;;  %v945_v9 = vadd.f32 %v881_v7, %v817_v60  ;;  %v818_v10 = vsel %vm498_vm10, %v690_v63, 0.0  ;;  %v882_v11 = vsel %vm626_vm11, %v754_v0, 0.0  ;;  %vm499_vm12 = vcmp.ne.s32.totalorder %v435_v2, 0 }
  0xb5   : > { %1072 = vst [vmem:[%s1751_s20 + $0x1d8] sm:$0xff] %v1008_v6  ;;  %v946_v12 = vadd.f32 %v882_v11, %v818_v10  ;;  %vm627_vm13 = vcmp.ne.s32.totalorder %v563_v3, 0  ;;  %v819_v13 = vsel %vm499_vm12, %v691_v4, 0.0  ;;  %v436_v14 = vand.u32 1, %v372_v5 }
  0xb6   : > { %v1009_v16 = vmul.f32 2.0, %v945_v9  ;;  %v883_v17 = vsel %vm627_vm13, %v755_v8, 0.0  ;;  %v564_v18 = vand.u32 2, %v372_v5 }
  0xb7   : > { %v1010_v20 = vmul.f32 2.0, %v946_v12  ;;  %v947_v21 = vadd.f32 %v883_v17, %v819_v13  ;;  %vm500_vm14 = vcmp.ne.s32.totalorder %v436_v14, 0 }
  0xb8   : > { %1073 = vst [vmem:[%s1751_s20 + $0x1e0] sm:$0xff] %v1009_v16  ;;  %vm628_vm15 = vcmp.ne.s32.totalorder %v564_v18, 0  ;;  %v820_v22 = vsel %vm500_vm14, %v692_v15, 0.0 }
  0xb9   : > { %1074 = vst [vmem:[%s1751_s20 + $0x1e8] sm:$0xff] %v1010_v20  ;;  %v1011_v23 = vmul.f32 2.0, %v947_v21  ;;  %v884_v24 = vsel %vm628_vm15, %v756_v19, 0.0 }
  0xba   : > { %v948_v25 = vadd.f32 %v884_v24, %v820_v22 }
  0xbb   : > { %1075 = vst [vmem:[%s1751_s20 + $0x1f0] sm:$0xff] %v1011_v23 }
  0xbc   : > { %v1012_v26 = vmul.f32 2.0, %v948_v25 }
  0xbe   : > { %1076 = vst [vmem:[%s1751_s20 + $0x1f8] sm:$0xff] %v1012_v26 }
  0xbf   : > { %1481 = shalt.err (!%p1478_p11)
}
  0xc0   : > { %s1561_s9 = smov 512   ;;  %s1562_s5 = smov 1024  }
  0xc1   : > { %s1563_s21 = smov 32  }
  0xc2   : > { %1276 = dma.vmem_to_hbm [thread:$0]  (%p1653_p9), %s1094_s26, 8192, %s1096_s8, %s1078_s11, %s1561_s9, %s1562_s5, %s1563_s21  }
  0xc3 PF: > { %s2285_s1 = sld [smem:[#allocation16_spill]] }
  0xc4   : > { %s2286_s12 = sld [smem:[#allocation12_spill]] }
  0xc9   : > { %p1293_p13 = scmp.ge.s32.totalorder %s2285_s1, 2 }
  0xca   : > { %s1110_s18 = sand.u32 1, %s2286_s12  }
  0xcb   : > { %p1289_p0 = pnand %p1293_p13, %p1659_p12  ;;  %s1111_s19 = scalar_lea.sflag [#allocation4], %s1110_s18 }
  0xcd   : > { %p1290_p1 = pneg %p1289_p0 }
  0xcf   : > { %1523 = dma.done.wait (%p1290_p1), %s1111_s19, 8192  }
  0xd0   : > { %1525 = vsyncadd (%p1290_p1), %s1111_s19, 4294959104  ;;  %s22_s19 = sadd.s32 1, %s2285_s1   ;;  %s2288_s20 = sld [smem:[#allocation13_spill]] }
  0xd1   : > { %p19_p2 = scmp.ge.s32.totalorder %s22_s19, 6   ;;  %s2289_s14 = sld [smem:[#allocation20_spill]] }
  0xd2   : > { %s2290_s15 = sld [smem:[#allocation14_spill]]  ;;  %s2294_s12 = smov %s1532_s13 }
  0xd3   : > { %s2291_s16 = sld [smem:[#allocation15_spill]]  ;;  %21 = sbr.rel (!%p19_p2) target bundleno = 11 (0xb), region = 101 }
  0xd4   : > { %s2292_s17 = sld [smem:[#allocation17_spill]] }
  0xd5   : > { %s2293_s18 = sld [smem:[#allocation18_spill]] }
  0xd6   : > { %s2295_s13 = smov %s2288_s20 }
  0xd8   :  { %1117 = vsyncpa [#allocation3], 1 }
  0xd9   :  { %1119 = vsyncpa [#allocation3 + $0x1], 1 }
  0xda   :  { %1120 = vsyncpa [#allocation6], 1 }
  0xdb   :  { %1122 = vsyncpa [#allocation6 + $0x1], 1 }
  0xdc   :  { %1123 = vsyncpa [#allocation4], 1 }
  0xdd   :  { %1125 = vsyncpa [#allocation4 + $0x1], 1 }

</bundles_post_ra>
